<compile_context>
chip_gen: v7x
topology: tpu7x:2x2x1
jax: 0.10.0
libtpu: 0.0.40
codegen_flags: <defaults>
</compile_context>

<pallas_src>
import functools

import jax
import jax.numpy as jnp
import numpy as np
from jax.experimental import pallas as pl
from jax.experimental.pallas import tpu as pltpu

C_OUT = 32             # conv out channels
KH, KW = 4, 4          # conv kernel
POOL_H, POOL_W = 3, 4  # maxpool kernel
LANE = 128
TB_MAX = 1024          # batch rows per grid step at large batch (sweep 512-2048)


def _cdiv(a, b):
    return -(-a // b)


def _round_up(a, m):
    return _cdiv(a, m) * m


def _pick_tb(b):
    """Batch rows per grid step.

    Large tiles amortize the ~0.35us per-grid-step overhead; TB is a multiple
    of 128 (lane-dense output block legality) and capped so the batch splits
    into >=2 blocks whenever it can, keeping both v7x TensorCores busy.
    """
    if b <= LANE:
        return b                                   # one full-array block
    return min(TB_MAX, _round_up(_cdiv(b, 2), LANE))


def _cnn_kernel(x_ref, wmat_ref, params_ref, bl_ref, o_ref, *, c_out):
    """Fused conv(one 2-D matmul) + full-window maxpool + bias + ReLU + linear.

    x_ref      : (TB, HW)  f32  flattened input rows (batch tile on sublanes)
    wmat_ref   : (HW, P*C) bf16 conv expressed as a dense matmul weight (p-major)
    params_ref : (2, C)    f32  row 0 = conv bias; row 1 = linear weight
    bl_ref     : (1, 1)   SMEM  linear bias scalar
    o_ref      : (1, TB)   f32  lane-dense output (batch on the lane axis)
    """
    # Conv2d(1->C, 4x4, stride 1) as a single flat bf16 MXU matmul, f32 accum.
    x = x_ref[...].astype(wmat_ref.dtype)                           # bf16 cast in-VMEM
    conv = jnp.dot(x, wmat_ref[...],
                   preferred_element_type=jnp.float32)              # (TB, P*C) = (TB, 384)

    # MaxPool2d((3,4)) over the whole conv output == max over the 12 position
    # column groups (columns p-major: [p0: c0..c31 | p1: c0..c31 | ...]).
    # Step 1: aligned full-vreg maxes over the three 128-lane position blocks.
    y = jnp.maximum(jnp.maximum(conv[:, 0:128], conv[:, 128:256]), conv[:, 256:384])
    # Step 2: collapse the 4 intra-vreg 32-lane groups with XLU lane rolls.
    y = jnp.maximum(y, pltpu.roll(y, shift=64, axis=1))
    y = jnp.maximum(y, pltpu.roll(y, shift=32, axis=1))
    pooled = y[:, 0:c_out]                                           # (TB, C) full max

    # Bias + ReLU hoisted after the pool: max_p(y_p + b) = max_p(y_p) + b and
    # ReLU(max) = max(ReLU) since ReLU is monotone -> exactly equivalent.
    pooled = jnp.maximum(pooled + params_ref[0:1, :], 0.0)

    # Linear(32 -> 1) on VPU + XLU: lane multiply then cross-lane sum.
    wl = params_ref[1:2, :]                                          # (1, C)
    out = jnp.sum(pooled * wl, axis=-1) + bl_ref[0, 0]               # (TB,)
    o_ref[0, :] = out.astype(o_ref.dtype)


def _build_conv_matmul_weight(conv_w, oh, ow):
    """Express Conv2d(1->C, (KH,KW), stride 1, VALID) on an (H,W) image as a
    dense (H*W, P*C) matmul weight, columns p-major (index p*C+c), bf16."""
    c_out, _, kh, kw = conv_w.shape
    h, w = oh + kh - 1, ow + kw - 1
    # Constant scatter selector built with numpy at trace time:
    # sel[hw, p, t] = 1 iff image pixel hw feeds tap t of conv position p.
    sel = np.zeros((h * w, oh * ow, kh * kw), dtype=np.float32)
    p_idx = 0
    for py in range(oh):
        for px in range(ow):
            t_idx = 0
            for dy in range(kh):
                for dx in range(kw):
                    sel[(py + dy) * w + (px + dx), p_idx, t_idx] = 1.0
                    t_idx += 1
            p_idx += 1
    wt = conv_w.reshape(c_out, kh * kw).astype(jnp.float32)          # (C, T)
    wmat = jnp.einsum("hpt,ct->hpc", jnp.asarray(sel), wt)           # (HW, P, C)
    return wmat.reshape(h * w, oh * ow * c_out).astype(jnp.bfloat16)  # (HW, P*C) bf16


@jax.jit
def cnn_model_forward(x, conv_w, conv_b, lin_w, lin_b):
    """x: (B, 1, H, W) NCHW like the PyTorch module. Returns (B, 1) float32."""
    B, cin, H, W = x.shape
    c_out, _, kh, kw = conv_w.shape
    oh, ow = H - kh + 1, W - kw + 1
    # `view(-1, 32)` in the PyTorch forward only matches Flatten when the pool
    # window covers the entire conv output (pooled spatial == 1x1).
    assert cin == 1 and (oh, ow) == (POOL_H, POOL_W), \
        "CNNModel.forward requires conv output == MaxPool kernel (use H=6, W=7)"
    assert c_out == C_OUT, "pool reduction scheme assumes 32 conv channels"
    P = oh * ow               # 12
    HW = H * W                # 42

    # ---- parameter-only preprocessing (no per-sample glue) ----------------
    wmat = _build_conv_matmul_weight(conv_w, oh, ow)                 # (HW, P*C) bf16
    params = jnp.concatenate(
        [conv_b.reshape(1, c_out).astype(jnp.float32),
         lin_w.reshape(1, c_out).astype(jnp.float32)], axis=0)       # (2, C)
    bl = lin_b.reshape(1, 1).astype(jnp.float32)

    # ---- data path: flatten only (free reshape), no batch pad -------------
    xf = x.reshape(B, HW).astype(jnp.float32)
    tb = _pick_tb(B)
    n_blk = _cdiv(B, tb)      # ragged last block handled by Pallas; extra rows
                              # are independent garbage and discarded below.

    kernel = functools.partial(_cnn_kernel, c_out=c_out)
    out = pl.pallas_call(
        kernel,
        out_shape=jax.ShapeDtypeStruct((1, B), jnp.float32),
        grid=(n_blk,),
        in_specs=[
            pl.BlockSpec((tb, HW), lambda b: (b, 0)),               # input rows
            pl.BlockSpec((HW, P * c_out), lambda b: (0, 0)),        # conv-as-matmul weight
            pl.BlockSpec((2, c_out), lambda b: (0, 0)),             # conv bias + linear weight
            pl.BlockSpec(memory_space=pltpu.MemorySpace.SMEM),      # linear bias scalar
        ],
        out_specs=pl.BlockSpec((1, tb), lambda b: (0, b)),          # lane-dense output
        compiler_params=pltpu.CompilerParams(
            dimension_semantics=("parallel",),      # shard batch tiles across TCs (v7x)
            vmem_limit_bytes=32 * 1024 * 1024,
        ),
    )(xf, wmat, params, bl)

    return out.reshape(B, 1)


def reference_forward(x, conv_w, conv_b, lin_w, lin_b):
    """Pure-JAX f32 reference mirroring the PyTorch forward."""
    conv = jax.lax.conv_general_dilated(
        x, conv_w, window_strides=(1, 1), padding="VALID",
        dimension_numbers=("NCHW", "OIHW", "NCHW"))
    conv = conv + conv_b[None, :, None, None]
    conv = jnp.maximum(conv, 0.0)
    pooled = jax.lax.reduce_window(
        conv, -jnp.inf, jax.lax.max,
        window_dimensions=(1, 1, POOL_H, POOL_W),
        window_strides=(1, 1, POOL_H, POOL_W), padding="VALID")
    flat = pooled.reshape(-1, C_OUT)                                 # matches view(-1, 32)
    return flat @ lin_w.T + lin_b


if __name__ == "__main__":
    key = jax.random.PRNGKey(0)
    kx, kcw, kcb, klw, klb = jax.random.split(key, 5)

    B, H, W = 2, 6, 7
    x = jax.random.normal(kx, (B, 1, H, W), dtype=jnp.float32)

    # Deterministic synthetic parameters (shapes per the nn.Module __init__).
    conv_w = 0.1 * jax.random.normal(kcw, (C_OUT, 1, KH, KW), dtype=jnp.float32)
    conv_b = 0.1 * jax.random.normal(kcb, (C_OUT,), dtype=jnp.float32)
    lin_w = 0.1 * jax.random.normal(klw, (1, C_OUT), dtype=jnp.float32)
    lin_b = 0.1 * jax.random.normal(klb, (1,), dtype=jnp.float32)

    out = cnn_model_forward(x, conv_w, conv_b, lin_w, lin_b)
    jax.block_until_ready(out)

    ref = reference_forward(x, conv_w, conv_b, lin_w, lin_b)
    assert out.shape == (B, 1), out.shape
    # bf16 MXU operands (f32 accumulation) -> slightly looser parity vs f32 ref.
    assert jnp.allclose(out, ref, atol=2e-2, rtol=2e-2), (out, ref)

    print("KERNEL_OK")
</pallas_src>

<mosaic_0001>
module attributes {stable_mosaic.version = 11 : i64} {
  func.func @_cnn_kernel(%arg0: i32, %arg1: memref<2x42xf32, #tpu.memory_space<vmem>>, %arg2: memref<42x384xbf16, #tpu.memory_space<vmem>>, %arg3: memref<2x32xf32, #tpu.memory_space<vmem>>, %arg4: memref<1x1xf32, #tpu.memory_space<smem>>, %arg5: memref<1x2xf32, #tpu.memory_space<vmem>>) attributes {dimension_semantics = [#tpu.dimension_semantics<parallel>], iteration_bounds = array<i64: 1>, scalar_prefetch = 0 : i64, scratch_operands = 0 : i64, tpu.core_type = #tpu.core_type<tc>, window_params = [{transform_indices = @transform_0, window_bounds = array<i64: 2, 42>}, {pipeline_mode = #tpu.pipeline_mode<synchronous>, transform_indices = @transform_1, window_bounds = array<i64: 42, 384>}, {pipeline_mode = #tpu.pipeline_mode<synchronous>, transform_indices = @transform_2, window_bounds = array<i64: 2, 32>}, {transform_indices = @transform_3, window_bounds = array<i64: 1, 1>}, {transform_indices = @transform_4, window_bounds = array<i64: 1, 2>}]} {
    %c0 = arith.constant 0 : index
    %c0_0 = arith.constant 0 : index
    %0 = vector.load %arg1[%c0, %c0_0] : memref<2x42xf32, #tpu.memory_space<vmem>>, vector<2x42xf32>
    %1 = arith.truncf %0 : vector<2x42xf32> to vector<2x42xbf16>
    %c0_1 = arith.constant 0 : index
    %c0_2 = arith.constant 0 : index
    %2 = vector.load %arg2[%c0_1, %c0_2] : memref<42x384xbf16, #tpu.memory_space<vmem>>, vector<42x384xbf16>
    %cst = arith.constant dense<0.000000e+00> : vector<2x384xf32>
    %3 = tpu.matmul %1, %2, %cst {dimension_numbers = #tpu.dot_dimension_numbers<[1], [0], [0], [1], [0, 0, 1, 1], [], []>} : vector<2x42xbf16>, vector<42x384xbf16>, vector<2x384xf32> -> vector<2x384xf32>
    %4 = vector.extract_strided_slice %3 {offsets = [0, 0], sizes = [2, 128], strides = [1, 1]} : vector<2x384xf32> to vector<2x128xf32>
    %5 = vector.extract_strided_slice %3 {offsets = [0, 128], sizes = [2, 128], strides = [1, 1]} : vector<2x384xf32> to vector<2x128xf32>
    %6 = arith.maximumf %4, %5 : vector<2x128xf32>
    %7 = vector.extract_strided_slice %3 {offsets = [0, 256], sizes = [2, 128], strides = [1, 1]} : vector<2x384xf32> to vector<2x128xf32>
    %8 = arith.maximumf %6, %7 : vector<2x128xf32>
    %c64_i32 = arith.constant 64 : i32
    %9 = tpu.dynamic_rotate %8 by %c64_i32 dim 1 : vector<2x128xf32>, i32 -> vector<2x128xf32>
    %10 = arith.maximumf %8, %9 : vector<2x128xf32>
    %c32_i32 = arith.constant 32 : i32
    %11 = tpu.dynamic_rotate %10 by %c32_i32 dim 1 : vector<2x128xf32>, i32 -> vector<2x128xf32>
    %12 = arith.maximumf %10, %11 : vector<2x128xf32>
    %13 = vector.extract_strided_slice %12 {offsets = [0, 0], sizes = [2, 32], strides = [1, 1]} : vector<2x128xf32> to vector<2x32xf32>
    %c0_3 = arith.constant 0 : index
    %c0_4 = arith.constant 0 : index
    %14 = vector.load %arg3[%c0_3, %c0_4] : memref<2x32xf32, #tpu.memory_space<vmem>>, vector<1x32xf32>
    %15 = vector.broadcast %14 : vector<1x32xf32> to vector<2x32xf32>
    %16 = arith.addf %13, %15 : vector<2x32xf32>
    %cst_5 = arith.constant 0.000000e+00 : f32
    %17 = vector.broadcast %cst_5 : f32 to vector<2x32xf32>
    %18 = arith.maximumf %16, %17 : vector<2x32xf32>
    %c1 = arith.constant 1 : index
    %c0_6 = arith.constant 0 : index
    %19 = vector.load %arg3[%c1, %c0_6] : memref<2x32xf32, #tpu.memory_space<vmem>>, vector<1x32xf32>
    %20 = vector.broadcast %19 : vector<1x32xf32> to vector<2x32xf32>
    %21 = arith.mulf %18, %20 : vector<2x32xf32>
    %cst_7 = arith.constant dense<0.000000e+00> : vector<2xf32>
    %22 = vector.multi_reduction <add>, %21, %cst_7 [1] : vector<2x32xf32> to vector<2xf32>
    %c0_8 = arith.constant 0 : index
    %c0_9 = arith.constant 0 : index
    %23 = memref.load %arg4[%c0_8, %c0_9] : memref<1x1xf32, #tpu.memory_space<smem>>
    %24 = vector.broadcast %23 : f32 to vector<2xf32>
    %25 = arith.addf %22, %24 : vector<2xf32>
    %c0_10 = arith.constant 0 : index
    %c0_11 = arith.constant 0 : index
    %26 = vector.load %arg5[%c0_10, %c0_11] : memref<1x2xf32, #tpu.memory_space<vmem>>, vector<1x2xf32>
    %27 = vector.shape_cast %26 : vector<1x2xf32> to vector<2xf32>
    %28 = vector.shape_cast %25 : vector<2xf32> to vector<1x2xf32>
    tpu.vector_store %arg5[%c0_10, %c0_11], %28 {strides = array<i32>} : memref<1x2xf32, #tpu.memory_space<vmem>>, vector<1x2xf32>,
    return
  }
  func.func @transform_0(%arg0: i32) -> (i32, i32) {
    %c0_i32 = arith.constant 0 : i32
    %c0_i32_0 = arith.constant 0 : i32
    return %arg0, %c0_i32 : i32, i32
  }
  func.func @transform_1(%arg0: i32) -> (i32, i32) {
    %c0_i32 = arith.constant 0 : i32
    %c0_i32_0 = arith.constant 0 : i32
    %c0_i32_1 = arith.constant 0 : i32
    return %c0_i32, %c0_i32_0 : i32, i32
  }
  func.func @transform_2(%arg0: i32) -> (i32, i32) {
    %c0_i32 = arith.constant 0 : i32
    %c0_i32_0 = arith.constant 0 : i32
    %c0_i32_1 = arith.constant 0 : i32
    return %c0_i32, %c0_i32_0 : i32, i32
  }
  func.func @transform_3(%arg0: i32) -> (i32, i32) {
    %c0_i32 = arith.constant 0 : i32
    %c0_i32_0 = arith.constant 0 : i32
    %c0_i32_1 = arith.constant 0 : i32
    return %c0_i32, %c0_i32_0 : i32, i32
  }
  func.func @transform_4(%arg0: i32) -> (i32, i32) {
    %c0_i32 = arith.constant 0 : i32
    %c0_i32_0 = arith.constant 0 : i32
    return %c0_i32, %arg0 : i32, i32
  }
}

</mosaic_0001>

<bundles_post_ra>
// kernel: cnn_model_forward.1
= control target key start
LH: loop header
LB: loop body
LE: loop exit
PB: predicated region body
PF: predicated region fallthrough
CT: control target
= control target key end

     0   :  { %v296_v1 = vmov 0.0   ;;  %v297_v6 = vmov 0   ;;  %vm298_vm0 = vmmov 0   ;;  %vm83_vm1 = vcmask 1044480   ;;  %s378_s0 = inlined_call_operand.vmem [shape: f32[2,42], index: 0, kind: input, shape index: {}]   ;;  %s379_s1 = inlined_call_operand.vmem [shape: bf16[42,384], index: 1, kind: input, shape index: {}]   ;;  %s380_s2 = inlined_call_operand.vmem [shape: f32[2,32], index: 2, kind: input, shape index: {}]   ;;  %s381_s3 = inlined_call_operand.<no memory space> [shape: f32[1,1], index: 3, kind: input, shape index: {}]   ;;  %s382_s4 = inlined_call_operand.hbm [shape: f32[1,2], index: 4, kind: output, shape index: {}]  }
   0x1   :  { %v260_v0 = vld [vmem:[%s379_s1 + $0x4] ss:$12 sps:$4 sm:$0xff]   ;;  %244 = vmatprep.subr.bf16.mxu1 %v296_v1  ;;  %v262_v2 = vld [vmem:[%s379_s1] ss:$12 sps:$4 sm:$0xff]   ;;  %v263_v3 = vld [vmem:[%s379_s1 + $0x8] ss:$12 sps:$4 sm:$0xff]   ;;  %125 = vmatprep.mubr.bf16.mxu0 %v297_v6 }
   0x2   :  { %93 = vmatprep.subr.bf16.mxu0 %v260_v0  ;;  %v264_v4 = vld [vmem:[%s379_s1 + $0x1c] ss:$12 sps:$4 sm:$0xff]   ;;  %v266_v5 = vld [vmem:[%s379_s1 + $0x18] ss:$12 sps:$4 sm:$0xff]   ;;  %245 = vmatpush3.bf16.msra.mxu1 %v263_v3  ;;  %v267_v7 = vld [vmem:[%s379_s1 + $0x20] ss:$12 sps:$4 sm:$0xff]  }
   0x3   :  { %94 = vmatpush1.bf16.msra.mxu0 %v262_v2  ;;  %250 = vmatprep.mubr.msk.bf16.mxu1 %vm298_vm0, %v296_v1  ;;  %v268_v8 = vld [vmem:[%s379_s1 + $0x34] ss:$12 sps:$4 sm:$0x1f]   ;;  %v270_v9 = vld [vmem:[%s379_s1 + $0x30] ss:$12 sps:$4 sm:$0x1f]  }
   0x4   :  { %95 = vmatprep.subr.bf16.mxu0 %v264_v4  ;;  %246 = vmatprep.subr.bf16.mxu1 %v296_v1  ;;  %v271_v10 = vld [vmem:[%s379_s1 + $0x38] ss:$12 sps:$4 sm:$0x1f]   ;;  %v85_v11 = vsel %vm83_vm1, %v270_v9, 0  ;;  %v20_v12 = vld [vmem:[%s378_s0] sm:$0x3] }
   0x6   :  { %247 = vmatpush3.bf16.msra.mxu1 %v267_v7 }
   0x7   :  { %96 = vmatpush1.bf16.msra.mxu0 %v266_v5 }
   0x8   :  { %235 = vmatprep.subr.msk.bf16.mxu0 %vm83_vm1, %v268_v8 }
   0x9   :  { %10 = vsyncpa [#allocation4], 0  ;;  %248 = vmatprep.subr.bf16.mxu1 %v296_v1  ;;  %v91_v13 = vsel %vm83_vm1, %v271_v10, 0  ;;  %v21_v14 = vpack.c.bf16 %v20_v12, %v20_v12  ;;  %vm79_vm2 = vcmask 343040   ;;  %s299_s0 = smov 64   ;;  %s300_s1 = smov 32   ;;  %v203_v35 = vlaneseq }
   0xa   :  { %249 = vmatpush3.bf16.msra.mxu1 %v91_v13  ;;  %v238_v27 = vld [vmem:[%s380_s2] ss:$0 sm:$0xff]  ;;  %v239_v31 = vld [vmem:[%s380_s2 + $0x1] ss:$0 sm:$0xff]  ;;  %vm195_vm3 = vcmask 254976   ;;  %v200_v38 = vstv %s381_s3  ;;  %s301_s15 = smov [#allocation3]  }
   0xb   :  { %98 = vmatpush1.bf16.msra.mxu0 %v85_v11  ;;  %v204_v36 = vand.u32 127, %v203_v35  ;;  %v206_v37 = vshrl.u32 %v203_v35, 7  ;;  %s218_s16 = sshll.u32 %s301_s15, 4  ;;  %vm210_vm4 = vcmask 8192   ;;  %s219_s16 = int_to_ptr.vmem [resolvable:$true] %s218_s16 }
   0xc   :  { %s272_s2 = scalar_lea.vmem %s219_s16, 16  ;;  %s276_s17 = scalar_lea.vmem %s219_s16, 32 }
   0xd   :  { %251 = vmatmul.mubr.msk.bf16.vlgmr.msra.gmra.mrb[0].mxu1 %vm79_vm2, %v21_v14  ;;  %v207_v39 = vsub.s32 %v204_v36, %v206_v37  ;;  %p273_p0 = scmp.ne.s32.totalorder %s219_s16, %s272_s2  ;;  %p277_p1 = scmp.lt.s32.totalorder %s219_s16, %s219_s16 }
   0xe   :  { %236 = vmatmul.mubr.msk.bf16.vlgmr.msra.gmra.mrb[0].mxu0 %vm79_vm2, %v21_v14  ;;  %p278_p2 = scmp.lt.s32.totalorder %s276_s17, %s272_s2 }
  0x10   :  { %p279_p3 = por %p278_p2, %p277_p1 }
  0x12   :  { %p280_p4 = pnand %p279_p3, %p273_p0 }
  0xe0   :  { %v168_v16 = vpop.f32.mrb[0].mxu1 }
  0xe1   :  { %v127_v15 = vpop.f32.mrb[0].mxu0  ;;  %v252_v19 = vpop.f32.mrb[1].mxu1 }
  0xe2   :  { %v129_v17 = vpop.f32.mrb[1].mxu0  ;;  %v171_v21 = vpop.f32.mrb[2].mxu1 }
  0xe3   :  { %v174_v18 = vmax.f32 %v127_v15, %v129_v17  ;;  %v131_v20 = vpop.f32.mrb[2].mxu0  ;;  %v253_v23 = vpop.f32.mrb[3].mxu1 }
  0xe4   :  { %v132_v22 = vpop.f32.mrb[3].mxu0 }
  0xe5   :  { %v175_v24 = vmax.f32 %v174_v18, %v168_v16 }
  0xe7   :  { %176 = vrot.lane.b32.xlu0 %v175_v24, %s299_s0 }
 0x159   :  { %v177_v25 = vpop.permute.xlu0 %176 }
 0x15a   :  { %v178_v26 = vmax.f32 %v175_v24, %v177_v25 }
 0x15c   :  { %179 = vrot.lane.b32.xlu0 %v178_v26, %s300_s1 }
 0x1ce   :  { %v180_v28 = vpop.permute.xlu0 %179 }
 0x1cf   :  { %v181_v29 = vmax.f32 %v178_v26, %v180_v28 }
 0x1d1   :  { %v187_v30 = vadd.f32 %v238_v27, %v181_v29 }
 0x1d3   :  { %v188_v32 = vmax.f32 %v187_v30, 0.0 }
 0x1d5   :  { %v194_v33 = vmul.f32 %v239_v31, %v188_v32 }
 0x1d7   :  { %v196_v34 = vsel %vm195_vm3, %v194_v33, 0.0 }
 0x1d8   :  { %197 = vadd.xlane.f32.xlu1 %v196_v34 }
 0x265   :  { %v198_v40 = vpop.xlane.xlu1 %197 }
 0x266   :  { %v201_v41 = vadd.f32 %v200_v38, %v198_v40 }
 0x268   :  { %v208_v42 = vrot.slane %v201_v41, %v207_v39 }
 0x26a   :  { %211 = vst.msk [vmem:[#allocation3] sm:$0x1] %vm210_vm4, %v208_v42 }
 0x26b   :  { %283 = shalt.err (!%p280_p4)
}
 0x26c   :  { %s284_s3 = scalar_lea.hbm %s382_s4, 16 }
 0x26d   :  { %p285_p5 = scmp.ne.s32.totalorder %s382_s4, %s284_s3  ;;  %p288_p6 = scmp.lt.u32.totalorder %s284_s3, %s382_s4 }
 0x26f   :  { %p290_p7 = pnand %p288_p6, %p285_p5 }
 0x271   :  { %293 = shalt.err (!%p290_p7)
}
 0x272   :  { %221 = dma.vmem_to_hbm [thread:$0]  %s219_s16, 16, %s382_s4, [#allocation4]  }
 0x273   :  { %294 = dma.done.wait [#allocation4], 16  }
 0x274   :  { %295 = vsyncadd [#allocation4], 4294967280 }
 0x275   :  { %225 = vsyncpa [#allocation4], 1 }

</bundles_post_ra>
